<compile_context>
chip_gen: v5e
topology: v5e:2x2
jax: 0.10.0
libtpu: 0.0.40
codegen_flags: <defaults>
</compile_context>

<pallas_src>
import jax
import jax.numpy as jnp
from jax.experimental import pallas as pl
from jax.experimental.pallas import tpu as pltpu


def _vmem_capacity_bytes():
    """Physical VMEM per TensorCore; conservative 64 MiB (v7x) fallback."""
    try:
        cap = getattr(pltpu.get_tpu_info(), "vmem_capacity_bytes", None)
        if cap:
            return int(cap)
    except Exception:
        pass
    return 64 * 1024 * 1024


def _attn_avg_kernel(x_ref, w_ref, o_ref):
    # x_ref: (TB, S, C) native dtype; w_ref: (1, C) f32; o_ref: (TB, C)
    x = x_ref[...]                                   # keep native dtype, single HBM pass
    tb, s, c = x.shape
    w_row = w_ref[...].reshape(1, 1, c)              # (1, 1, C) f32

    # Logits on the VPU/XLU (mul + lane reduce), f32 math regardless of x dtype.
    # Bias omitted: a uniform shift cancels in the softmax over the seq axis.
    logits = jnp.sum(x * w_row, axis=-1, keepdims=True)        # (TB, S, 1) f32

    # Softmax over the sequence axis (axis=1), f32 throughout.
    m = jnp.max(logits, axis=1, keepdims=True)                  # (TB, 1, 1)
    e = jnp.exp(logits - m)                                     # (TB, S, 1)
    denom = jnp.sum(e, axis=1, keepdims=True)                   # (TB, 1, 1)

    # Weighted average: VPU mul + sublane reduce with f32 accumulation.  Keeps
    # the whole x block off the MXU (no M=1 weight-load streaming of x).
    acc = jnp.sum(e * x, axis=1)                                # (TB, C) f32
    out = acc * pl.reciprocal(denom[:, 0, :], approx=False)     # (TB, C) f32

    o_ref[...] = out.astype(o_ref.dtype)                        # dense (TB, C) store


def _pick_block_b(B, S, C, dtype, vmem_capacity_bytes):
    """Batch rows per grid step.

    Budget ~VMEM/8 per (TB, S, C) x block: the BlockSpec pipeline double-buffers
    it and the kernel builds block-sized f32 intermediates, so the peak stays
    comfortably under the 3/4-of-VMEM scoped limit on every generation.
    """
    itemsize = jnp.dtype(dtype).itemsize
    sublane = 8 * max(1, 4 // itemsize)            # 8 f32 / 16 bf16 / 32 int8
    row_bytes = max(1, S * C * itemsize)
    target_bytes = min(max(vmem_capacity_bytes // 8, 4 << 20), 16 << 20)
    rows = max(1, target_bytes // row_bytes)

    # >= 2 grid steps whenever B >= 2 (>= 4 when B allows) so both of v7x's
    # TensorCores get work under dimension_semantics=("parallel",).
    if B >= 8:
        rows = min(rows, B // 4)
    elif B >= 2:
        rows = min(rows, B // 2)
    rows = max(1, min(rows, B))
    if rows >= B:
        return B

    if rows >= sublane:
        rows = (rows // sublane) * sublane         # sublane-dense (dtype-aware)
        step = sublane
    else:
        step = 1

    # Prefer an exact divisor of B (no padded tail step) without shrinking the
    # block by more than 2x; among divisors prefer an even grid count so the
    # two-TensorCore split is balanced.
    best = 0
    for d in range(rows, max(rows // 2, 1) - 1, -step):
        if B % d == 0:
            if best == 0:
                best = d
            if (B // d) % 2 == 0:
                return d
    return best if best else rows                   # padded tail step: rows are
                                                    # independent, extras sliced off


def attention_weighted_average(x, w, b=None):
    """x: (B, S, C); w: (1, C) Linear weight; b: (1,) Linear bias (a softmax no-op).
    Returns (B, 1, C), matching AttentionWeightedAverage.forward."""
    B, S, C = x.shape
    del b  # softmax(x @ W^T + b) == softmax(x @ W^T): single-logit bias cancels

    cap = _vmem_capacity_bytes()
    tb = _pick_block_b(B, S, C, x.dtype, cap)
    grid_b = pl.cdiv(B, tb)
    vmem_limit = min((cap * 3) // 4, 112 * 1024 * 1024)

    itemsize = jnp.dtype(x.dtype).itemsize
    cost = pl.CostEstimate(
        flops=4 * B * S * C,                       # two muls + two reduce-adds / elem
        transcendentals=B * S,                     # exp over logits
        bytes_accessed=(B * S * C + B * C) * itemsize + C * 4,
    )

    # Output as (grid_b, tb, C): both trailing block dims equal the array dims,
    # so any tb (including tb < 8) is legal and the stores stay unmasked.
    out3 = pl.pallas_call(
        _attn_avg_kernel,
        out_shape=jax.ShapeDtypeStruct((grid_b, tb, C), x.dtype),
        grid_spec=pltpu.PrefetchScalarGridSpec(
            num_scalar_prefetch=0,
            grid=(grid_b,),
            in_specs=[
                pl.BlockSpec((tb, S, C), lambda i: (i, 0, 0)),
                pl.BlockSpec((1, C), lambda i: (0, 0)),
            ],
            out_specs=pl.BlockSpec((None, tb, C), lambda i: (i, 0, 0)),
        ),
        compiler_params=pltpu.CompilerParams(
            dimension_semantics=("parallel",),
            vmem_limit_bytes=vmem_limit,
        ),
        cost_estimate=cost,
    )(x, w.astype(jnp.float32))

    return out3.reshape(grid_b * tb, C)[:B].reshape(B, 1, C)


def _reference(x, w, b):
    logits = jnp.einsum("bsc,oc->bso", x, w) + b               # (B, S, 1)
    attn = jax.nn.softmax(logits, axis=1)
    return jnp.sum(attn * x, axis=1, keepdims=True)            # (B, 1, C)


if __name__ == "__main__":
    key = jax.random.PRNGKey(0)
    kx, kw, kb = jax.random.split(key, 3)

    B, S, C = 2, 8, 32  # batch, seq_len, num_channels

    x = jax.random.normal(kx, (B, S, C), dtype=jnp.float32)

    # nn.Linear(num_channels, 1): weight (1, C), bias (1,) — deterministic init
    bound = 1.0 / (C ** 0.5)
    w = jax.random.uniform(kw, (1, C), minval=-bound, maxval=bound, dtype=jnp.float32)
    bias = jax.random.uniform(kb, (1,), minval=-bound, maxval=bound, dtype=jnp.float32)

    out = attention_weighted_average(x, w, bias)
    out = jax.block_until_ready(out)

    ref = _reference(x, w, bias)
    assert out.shape == (B, 1, C)
    assert jnp.allclose(out, ref, atol=1e-5, rtol=1e-5), "mismatch vs reference"

    print("KERNEL_OK")
</pallas_src>

<mosaic_0001>
module attributes {stable_mosaic.version = 11 : i64} {
  func.func @_attn_avg_kernel(%arg0: i32, %arg1: memref<1x8x32xf32, #tpu.memory_space<vmem>>, %arg2: memref<1x32xf32, #tpu.memory_space<vmem>>, %arg3: memref<1x1x32xf32, #tpu.memory_space<vmem>>) attributes {dimension_semantics = [#tpu.dimension_semantics<parallel>], iteration_bounds = array<i64: 2>, scalar_prefetch = 0 : i64, scratch_operands = 0 : i64, tpu.core_type = #tpu.core_type<tc>, window_params = [{transform_indices = @transform_0, window_bounds = array<i64: 1, 8, 32>}, {pipeline_mode = #tpu.pipeline_mode<synchronous>, transform_indices = @transform_1, window_bounds = array<i64: 1, 32>}, {transform_indices = @transform_2, window_bounds = array<i64: 1, 1, 32>}]} {
    %c0 = arith.constant 0 : index
    %c0_0 = arith.constant 0 : index
    %c0_1 = arith.constant 0 : index
    %0 = vector.load %arg1[%c0, %c0_0, %c0_1] : memref<1x8x32xf32, #tpu.memory_space<vmem>>, vector<1x8x32xf32>
    %c0_2 = arith.constant 0 : index
    %c0_3 = arith.constant 0 : index
    %1 = vector.load %arg2[%c0_2, %c0_3] : memref<1x32xf32, #tpu.memory_space<vmem>>, vector<1x32xf32>
    %2 = vector.shape_cast %1 : vector<1x32xf32> to vector<1x1x32xf32>
    %3 = vector.broadcast %2 : vector<1x1x32xf32> to vector<1x8x32xf32>
    %4 = arith.mulf %0, %3 : vector<1x8x32xf32>
    %cst = arith.constant dense<0.000000e+00> : vector<1x8xf32>
    %5 = vector.multi_reduction <add>, %4, %cst [2] : vector<1x8x32xf32> to vector<1x8xf32>
    %6 = vector.shape_cast %5 : vector<1x8xf32> to vector<1x8x1xf32>
    %cst_4 = arith.constant dense<0xFF800000> : vector<1x1xf32>
    %7 = vector.multi_reduction <maximumf>, %6, %cst_4 [1] : vector<1x8x1xf32> to vector<1x1xf32>
    %8 = vector.shape_cast %7 : vector<1x1xf32> to vector<1x1x1xf32>
    %9 = vector.broadcast %8 : vector<1x1x1xf32> to vector<1x8x1xf32>
    %10 = arith.subf %6, %9 : vector<1x8x1xf32>
    %11 = math.exp %10 : vector<1x8x1xf32>
    %cst_5 = arith.constant dense<0.000000e+00> : vector<1x1xf32>
    %12 = vector.multi_reduction <add>, %11, %cst_5 [1] : vector<1x8x1xf32> to vector<1x1xf32>
    %13 = vector.shape_cast %12 : vector<1x1xf32> to vector<1x1x1xf32>
    %14 = vector.broadcast %11 : vector<1x8x1xf32> to vector<1x8x32xf32>
    %15 = arith.mulf %14, %0 : vector<1x8x32xf32>
    %cst_6 = arith.constant dense<0.000000e+00> : vector<1x32xf32>
    %16 = vector.multi_reduction <add>, %15, %cst_6 [1] : vector<1x8x32xf32> to vector<1x32xf32>
    %17 = vector.shape_cast %13 : vector<1x1x1xf32> to vector<1x1xf32>
    %18 = tpu.reciprocal %17 : vector<1x1xf32> -> vector<1x1xf32>
    %19 = vector.broadcast %18 : vector<1x1xf32> to vector<1x32xf32>
    %20 = arith.mulf %16, %19 : vector<1x32xf32>
    %c0_7 = arith.constant 0 : index
    %c0_8 = arith.constant 0 : index
    %c0_9 = arith.constant 0 : index
    %21 = vector.load %arg3[%c0_7, %c0_8, %c0_9] : memref<1x1x32xf32, #tpu.memory_space<vmem>>, vector<1x1x32xf32>
    %22 = vector.shape_cast %21 : vector<1x1x32xf32> to vector<1x32xf32>
    %23 = vector.shape_cast %20 : vector<1x32xf32> to vector<1x1x32xf32>
    tpu.vector_store %arg3[%c0_7, %c0_8, %c0_9], %23 {strides = array<i32>} : memref<1x1x32xf32, #tpu.memory_space<vmem>>, vector<1x1x32xf32>,
    return
  }
  func.func @transform_0(%arg0: i32) -> (i32, i32, i32) {
    %c0_i32 = arith.constant 0 : i32
    %c0_i32_0 = arith.constant 0 : i32
    %c0_i32_1 = arith.constant 0 : i32
    return %arg0, %c0_i32, %c0_i32_0 : i32, i32, i32
  }
  func.func @transform_1(%arg0: i32) -> (i32, i32) {
    %c0_i32 = arith.constant 0 : i32
    %c0_i32_0 = arith.constant 0 : i32
    %c0_i32_1 = arith.constant 0 : i32
    return %c0_i32, %c0_i32_0 : i32, i32
  }
  func.func @transform_2(%arg0: i32) -> (i32, i32, i32) {
    %c0_i32 = arith.constant 0 : i32
    %c0_i32_0 = arith.constant 0 : i32
    %c0_i32_1 = arith.constant 0 : i32
    return %arg0, %c0_i32, %c0_i32_0 : i32, i32, i32
  }
}

</mosaic_0001>

<bundles_post_ra>
// kernel: tpu_custom_call.1
= control target key start
LH: loop header
LB: loop body
LE: loop exit
PB: predicated region body
PF: predicated region fallthrough
CT: control target
= control target key end

     0   :  { %7 = vsyncpa [#allocation3], 0  ;;  %s676_s0 = inlined_call_operand.hbm [shape: f32[2,8,32], index: 0, kind: input, shape index: {}]   ;;  %s677_s1 = inlined_call_operand.hbm [shape: f32[1,32], index: 1, kind: input, shape index: {}]   ;;  %s678_s2 = inlined_call_operand.hbm [shape: f32[2,1,32], index: 2, kind: output, shape index: {}]  }
   0x1   :  { %9 = vsyncpa [#allocation3 + $0x1], 0 }
   0x2   :  { %10 = vsyncpa [#allocation6], 0 }
   0x3   :  { %11 = vsyncpa [#allocation4], 0 }
   0x4   :  { %13 = vsyncpa [#allocation4 + $0x1], 0  ;;  %s535_s9 = smov 0   ;;  %s537_s10 = smov 0  }
   0x5   :  { %s539_s11 = smov 0   ;;  %s541_s12 = smov 0  }
   0x6 LB: > { %s556_s13 = sadd.s32 4294967295, %s517_s12   ;;  %s314_s14 = sadd.s32 4294967294, %s517_s12   ;;  %s517_s12 = sphi %s541_s12, %s688_s12   ;;  %s513_s11 = sphi %s539_s11, %s687_s11   ;;  %s509_s10 = sphi %s537_s10, %s686_s10   ;;  %s505_s9 = sphi %s535_s9, %s685_s9  }
   0x7   : > { %p39_p0 = scmp.ne.s32.totalorder %s509_s10, %s505_s9  ;;  %p40_p1 = scmp.eq.s32.totalorder %s556_s13, 0 }
   0x8   : > { %p84_p2 = scmp.eq.s32.totalorder %s556_s13, 1  ;;  %p90_p3 = scmp.eq.s32.totalorder %s314_s14, 1 }
   0x9   : > { %p565_p4 = por %p40_p1, %p39_p0  ;;  %p315_p5 = scmp.ge.s32.totalorder %s517_s12, 1 }
   0xa   : > { %p570_p6 = por %p90_p3, %p39_p0  ;;  %p97_p7 = scmp.lt.s32.totalorder %s517_s12, 3 }
   0xb   : > { %s109_s19 = sshll.u32 %s677_s1, 4  ;;  %s519_s21 = smov [#allocation5]   ;;  %s110_s19 = int_to_ptr.hbm [resolvable:$true] %s109_s19 }
   0xc   : > { %p578_p8 = pnand %p315_p5, %p97_p7  ;;  %s111_s22 = sshll.u32 %s519_s21, 4  ;;  %s112_s22 = int_to_ptr.vmem [resolvable:$true] %s111_s22 }
   0xd   : > { %s588_s23 = sadd.s32 1, %s517_s12   ;;  %s26_s24 = sadd.s32 1, %s513_s11 }
   0xe   : > { %p333_p10 = pneg %p578_p8  ;;  %s23_s25 = ssub.s32 %s517_s12, %s588_s23 }
   0xf   : > { %p24_p12 = scmp.eq.s32.totalorder %s23_s25, 0  ;;  %p33_p13 = scmp.ne.s32.totalorder %s513_s11, %s509_s10 }
  0x10   : > { %p334_p11 = pnand %p333_p10, %p40_p1  ;;  %p34_p0 = scmp.eq.s32.totalorder %s517_s12, 0 }
  0x11   : > { %s597_s26 = scalar_select %p24_p12, %s513_s11, %s26_s24  }
  0x12   : > { %336 = dma.hbm_to_vmem [thread:$0]  (!%p334_p11), %s110_s19, 16, %s112_s22, [#allocation6]  }
  0x13   : > { %p601_p3 = por %p84_p2, %p33_p13  ;;  %p346_p5 = scmp.lt.s32.totalorder %s517_s12, 2 }
  0x14   : > { %s122_s28 = sand.u32 1, %s513_s11   ;;  %s319_s29 = sshll.u32 %s517_s12, 3 }
  0x15   : > { %p35_p7 = por %p34_p0, %p33_p13  ;;  %s318_s30 = sshll.u32 %s122_s28, 3 }
  0x16   : > { %s130_s5 = scalar_lea.hbm %s676_s0, %s319_s29  ;;  %s126_s7 = scalar_lea.vmem [#allocation2], %s318_s30 }
  0x17   : > { %s132_s6 = sshll.u32 %s130_s5, 4  ;;  %s134_s8 = sshll.u32 %s126_s7, 4  ;;  %s133_s6 = int_to_ptr.hbm [resolvable:$true] %s132_s6  ;;  %s135_s8 = int_to_ptr.vmem [resolvable:$true] %s134_s8 }
  0x18   : > { %p611_p10 = pnand %p346_p5, %p35_p7  ;;  %s123_s17 = scalar_lea.sflag [#allocation3], %s122_s28 }
  0x19   : > { %s417_s18 = sshra.s32 %s133_s6, 4  ;;  %s424_s24 = scalar_lea.hbm %s676_s0, 16  ;;  %s418_s18 = int_to_ptr.hbm [resolvable:$true] %s417_s18 }
  0x1a   : > { %s419_s19 = scalar_lea.hbm %s418_s18, 8  ;;  %p421_p11 = pneg %p611_p10 }
  0x1b   : > { %p420_p2 = scmp.ne.s32.totalorder %s418_s18, %s419_s19  ;;  %p425_p0 = scmp.lt.s32.totalorder %s418_s18, %s676_s0 }
  0x1c   : > { %p426_p5 = scmp.lt.s32.totalorder %s424_s24, %s419_s19 }
  0x1d   : > { %p422_p12 = pnand %p421_p11, %p420_p2 }
  0x1e   : > { %p427_p7 = por %p426_p5, %p425_p0 }
  0x1f   : > { %p423_p13 = pneg %p422_p12 }
  0x21   : > { %p428_p9 = pnand %p427_p7, %p423_p13 }
  0x23   : > { %431 = shalt.err (!%p428_p9)
}
  0x24   : > { %340 = dma.hbm_to_vmem [thread:$0]  (!%p611_p10), %s133_s6, 128, %s135_s8, %s123_s17  }
  0x25   : > { %143 = sbr.rel (%p578_p8) target bundleno = 222 (0xde), region = 28  ;;  %s628_s28 = sand.u32 (!%p578_p8), 1, %s509_s10  }
  0x26   : > { %s321_s30 = sshll.u32 (!%p578_p8), %s628_s28, 3  ;;  %s146_s3 = scalar_lea.sflag (!%p578_p8), [#allocation3], %s628_s28 }
  0x27   : > { %s149_s4 = scalar_lea.vmem (!%p578_p8), [#allocation2], %s321_s30 }
  0x2a   : > { %492 = dma.done.wait (%p565_p4), %s146_s3, 128  }
  0x2b   : > { %494 = vsyncadd (%p565_p4), %s146_s3, 4294967168 }
  0x2c   : > { %496 = dma.done.wait (%p40_p1), [#allocation6], 16  }
  0x2d   : > { %498 = vsyncadd (%p40_p1), [#allocation6], 4294967280  ;;  %v175_v0 = vld [vmem:[%s149_s4] sm:$0xff]  ;;  %v382_v1 = vld [vmem:[#allocation5] ss:$0 sm:$0xff]  ;;  %vm181_vm0 = vcmask 261120   ;;  %s234_s5 = scalar_lea.hbm %s678_s2, %s556_s13 }
  0x2e   : > { %v180_v2 = vmul.f32 %v382_v1, %v175_v0  ;;  %s174_s6 = scalar_lea.vmem [#allocation7], %s628_s28  ;;  %s238_s8 = sshll.u32 %s234_s5, 4  ;;  %vm223_vm5 = vcmask 253952   ;;  %s239_s8 = int_to_ptr.hbm [resolvable:$true] %s238_s8 }
  0x2f   : > { %s236_s7 = sshll.u32 %s174_s6, 4  ;;  %s226_s14 = scalar_lea.sflag [#allocation4], %s628_s28  ;;  %s237_s7 = int_to_ptr.vmem [resolvable:$true] %s236_s7 }
  0x30   : > { %v182_v3 = vsel %vm181_vm0, %v180_v2, 0.0  ;;  %s461_s13 = sshra.s32 %s239_s8, 4  ;;  %s467_s21 = scalar_lea.hbm %s678_s2, 2  ;;  %s462_s13 = int_to_ptr.hbm [resolvable:$true] %s461_s13 }
  0x31   : > { %183 = vadd.xlane.f32.xlu0 %v182_v3  ;;  %s463_s17 = scalar_lea.hbm %s462_s13, 1  ;;  %p468_p9 = scmp.lt.s32.totalorder %s462_s13, %s678_s2 }
  0x32   : > { %p464_p1 = scmp.ne.s32.totalorder %s462_s13, %s463_s17  ;;  %p469_p10 = scmp.lt.s32.totalorder %s467_s21, %s463_s17 }
  0x34   : > { %p465_p4 = pnand %p464_p1, %p601_p3  ;;  %p470_p2 = por %p469_p10, %p468_p9 }
  0x36   : > { %p466_p8 = pneg %p465_p4 }
  0x38   : > { %p471_p11 = pnand %p470_p2, %p466_p8 }
  0xa4   : > { %v184_v4 = vpop.xlane.xlu0 %183 }
  0xa5   : > { %v185_v5 = vrot.slane %v184_v4, 4 }
  0xa7   : > { %v186_v6 = vmax.f32 %v184_v4, %v185_v5 }
  0xa9   : > { %v187_v7 = vrot.slane %v186_v6, 2 }
  0xab   : > { %v188_v8 = vmax.f32 %v186_v6, %v187_v7 }
  0xad   : > { %v189_v9 = vrot.slane %v188_v8, 1 }
  0xaf   : > { %v190_v10 = vmax.f32 %v188_v8, %v189_v9 }
  0xb1   : > { %v191_v11 = vsub.f32 %v184_v4, %v190_v10 }
  0xb3   : > { %v192_v12 = vmul.f32 1.442695, %v191_v11 }
  0xb5   : > { %383 = vpow2.f32 %v192_v12 }
  0xbb   : > { %v384_v13 = vpop.eup %383 }
  0xbc   : > { %v194_v14 = vrot.slane %v384_v13, 4  ;;  %v200_v15 = vmul.f32 %v384_v13, %v175_v0 }
  0xbe   : > { %v195_v16 = vadd.f32 %v384_v13, %v194_v14  ;;  %v201_v18 = vsel %vm181_vm0, %v200_v15, 0.0 }
  0xbf   : > { %v202_v20 = vrot.slane %v201_v18, 4 }
  0xc0   : > { %v196_v17 = vrot.slane %v195_v16, 2 }
  0xc1   : > { %v203_v23 = vadd.f32 %v202_v20, %v201_v18 }
  0xc2   : > { %v197_v19 = vadd.f32 %v196_v17, %v195_v16 }
  0xc3   : > { %v204_v24 = vrot.slane %v203_v23, 2 }
  0xc4   : > { %v198_v21 = vrot.slane %v197_v19, 1 }
  0xc5   : > { %v205_v26 = vadd.f32 %v204_v24, %v203_v23 }
  0xc6   : > { %v199_v22 = vadd.f32 %v198_v21, %v197_v19 }
  0xc7   : > { %v206_v30 = vrot.slane %v205_v26, 1 }
  0xc8   : > { %385 = vrcp.f32 %v199_v22  ;;  %v219_v29 = vand.u32 2147483648, %v199_v22  ;;  %v217_v32 = vand.u32 2147483647, %v199_v22  ;;  %vm213_vm2 = vweird.f32 %v199_v22 }
  0xc9   : > { %v207_v35 = vadd.f32 %v206_v30, %v205_v26 }
  0xca   : > { %v220_v34 = vor.u32 1.1754944e-38, %v219_v29  ;;  %vm218_vm4 = vcmp.eq.f32.partialorder %v217_v32, 8.507059e+37 }
  0xce   : > { %v386_v25 = vpop.eup %385 }
  0xcf   : > { %v209_v27 = vmul.f32 %v386_v25, %v199_v22  ;;  %vm214_vm1 = vweird.f32 %v386_v25 }
  0xd0   : > { %vm215_vm3 = vmor %vm213_vm2, %vm214_vm1 }
  0xd1   : > { %v210_v28 = vsub.f32 1.0, %v209_v27 }
  0xd3   : > { %v211_v31 = vmul.f32 %v386_v25, %v210_v28 }
  0xd5   : > { %v212_v33 = vadd.f32 %v386_v25, %v211_v31 }
  0xd7   : > { %v216_v36 = vsel %vm215_vm3, %v386_v25, %v212_v33 }
  0xd8   : > { %v221_v37 = vsel %vm218_vm4, %v220_v34, %v216_v36 }
  0xd9   : > { %v222_v38 = vmul.f32 %v221_v37, %v207_v35 }
  0xdb   : > { %224 = vst.msk [vmem:[%s174_s6] sm:$0x1] %vm223_vm5, %v222_v38 }
  0xdc   : > { %474 = shalt.err (!%p471_p11)
}
  0xdd   : > { %331 = dma.vmem_to_hbm [thread:$0]  (%p601_p3), %s237_s7, 16, %s239_s8, %s226_s14  }
  0xde PF: > { %s250_s25 = sand.u32 1, %s505_s9   ;;  %p684_p12 = scmp.ge.s32.totalorder %s517_s12, 2 }
  0xdf   : > { %s251_s29 = scalar_lea.sflag [#allocation4], %s250_s25 }
  0xe0   : > { %p342_p13 = pnand %p684_p12, %p570_p6 }
  0xe2   : > { %p343_p0 = pneg %p342_p13 }
  0xe4   : > { %500 = dma.done.wait (%p343_p0), %s251_s29, 16  }
  0xe5   : > { %502 = vsyncadd (%p343_p0), %s251_s29, 4294967280  ;;  %p16_p5 = scmp.ge.s32.totalorder %s588_s23, 4   ;;  %s685_s9 = smov %s509_s10 }
  0xe6   : > { %s686_s10 = smov %s513_s11  ;;  %s687_s11 = smov %s597_s26 }
  0xe7   : > { %s688_s12 = smov %s588_s23  ;;  %18 = sbr.rel (!%p16_p5) target bundleno = 6 (0x6), region = 77 }
  0xec   :  { %256 = vsyncpa [#allocation3], 1 }
  0xed   :  { %258 = vsyncpa [#allocation3 + $0x1], 1 }
  0xee   :  { %259 = vsyncpa [#allocation6], 1 }
  0xef   :  { %260 = vsyncpa [#allocation4], 1 }
  0xf0   :  { %262 = vsyncpa [#allocation4 + $0x1], 1 }

</bundles_post_ra>
